<compile_context>
chip_gen: v6e
topology: v6e:2x2x1
jax: 0.10.0
libtpu: 0.0.40
codegen_flags: <defaults>
</compile_context>

<pallas_src>
from functools import partial

import jax
import jax.numpy as jnp
from jax import lax
from jax.experimental import pallas as pl
from jax.experimental.pallas import tpu as pltpu

EPS = 1e-5  # torch nn.LayerNorm default


def _round_up(a, m):
    return ((a + m - 1) // m) * m


def patch_embed_kernel(x_ref, w_ref, b_ref, *rest, use_norm, embed_dim):
    # x_ref: (tm, K) patch tokens; w_ref: (K, E); b_ref / gamma / beta: (1, E)
    out_ref = rest[-1]
    x = x_ref[...]
    # Single fused projection matmul (== strided Conv3d), f32 accumulate.
    y = jnp.dot(x, w_ref[...], preferred_element_type=jnp.float32)
    y = y + b_ref[...].astype(jnp.float32)
    if use_norm:
        gamma_ref, beta_ref = rest[0], rest[1]
        inv_e = jnp.float32(1.0 / embed_dim)
        # LayerNorm over embed dim (biased variance, eps inside rsqrt — torch).
        mu = jnp.sum(y, axis=-1, keepdims=True) * inv_e
        yc = y - mu
        var = jnp.sum(yc * yc, axis=-1, keepdims=True) * inv_e
        y = yc * lax.rsqrt(var + EPS)
        y = y * gamma_ref[...].astype(jnp.float32) + beta_ref[...].astype(jnp.float32)
    out_ref[...] = y.astype(out_ref.dtype)


def patch_embed3d_forward(x, w, b, gamma=None, beta=None, *,
                          patch_size=(2, 4, 4), use_norm=False, tm=1024,
                          compute_dtype=jnp.bfloat16, out_dtype=None,
                          channels_last=False):
    """x: (B, C, D, H, W); w: (E, C, pd, ph, pw); b: (E,).

    Returns (B, E, Dp, Hp, Wp) (torch layout).  With channels_last=True returns
    (B, Dp, Hp, Wp, E) token-major and skips one full HBM pass.
    """
    B, C, D, H, W = x.shape
    E = w.shape[0]
    pd, ph, pw = patch_size
    K = C * pd * ph * pw
    cdt = x.dtype if compute_dtype is None else compute_dtype
    odt = x.dtype if out_dtype is None else out_dtype

    # Cast the activation stream first so every subsequent HBM pass (pad,
    # patch extraction, kernel read) moves half the bytes when cdt == bf16.
    x = x.astype(cdt)

    # Pad D/H/W at the end to multiples of the patch size (matches F.pad use).
    pad_d, pad_h, pad_w = (-D) % pd, (-H) % ph, (-W) % pw
    if pad_d or pad_h or pad_w:
        x = jnp.pad(x, ((0, 0), (0, 0), (0, pad_d), (0, pad_h), (0, pad_w)))
    Dp, Hp, Wp = (D + pad_d) // pd, (H + pad_h) // ph, (W + pad_w) // pw

    # Extract non-overlapping patches, token-major, features flattened in
    # (c, kd, kh, kw) order to match the Conv3d OIDHW weight layout.
    xt = x.reshape(B, C, Dp, pd, Hp, ph, Wp, pw)
    xt = jnp.transpose(xt, (0, 2, 4, 6, 1, 3, 5, 7))      # (B,Dp,Hp,Wp,C,pd,ph,pw)
    N = B * Dp * Hp * Wp
    tokens = xt.reshape(N, K)

    # Token tile: large (HBM-bound => big tiles), multiple of 16 (bf16 sublane
    # packing), clamped so the grid has >= 2 blocks whenever the token count
    # permits (v7x has two TensorCores on the "parallel" axis).
    tm_eff = max(16, min(tm, _round_up(N, 16)))
    if N > 16:
        tm_eff = min(tm_eff, max(16, _round_up(pl.cdiv(N, 2), 16)))
    n_blocks = pl.cdiv(N, tm_eff)
    Npad = n_blocks * tm_eff
    if Npad != N:
        tokens = jnp.pad(tokens, ((0, Npad - N), (0, 0)))

    w_mat = w.reshape(E, K).T.astype(cdt)                  # (K, E), VMEM-resident

    operands = [tokens, w_mat, b.astype(jnp.float32)[None, :]]
    in_specs = [
        pl.BlockSpec((tm_eff, K), lambda i: (i, 0)),       # patch tokens
        pl.BlockSpec((K, E), lambda i: (0, 0)),            # proj weight (resident)
        pl.BlockSpec((1, E), lambda i: (0, 0)),            # proj bias (resident)
    ]
    if use_norm:
        if gamma is None:
            gamma = jnp.ones((E,), jnp.float32)
        if beta is None:
            beta = jnp.zeros((E,), jnp.float32)
        operands += [gamma.astype(jnp.float32)[None, :],
                     beta.astype(jnp.float32)[None, :]]
        in_specs += [pl.BlockSpec((1, E), lambda i: (0, 0)),
                     pl.BlockSpec((1, E), lambda i: (0, 0))]
    # else: gamma/beta are not passed at all -> no pointless resident DMAs.

    # VMEM footprint ~ 2*tm*(K+E)*itemsize + K*E*itemsize (+ a few KB): well
    # under the scoped default on every generation at these sizes, so
    # vmem_limit_bytes is left untouched.  Re-derive against v7x's 64 MiB
    # physical (32 MiB scoped) before raising tm past ~4096 or for large E/K.
    kernel = partial(patch_embed_kernel, use_norm=use_norm, embed_dim=E)
    out_flat = pl.pallas_call(
        kernel,
        out_shape=jax.ShapeDtypeStruct((Npad, E), odt),
        grid_spec=pltpu.PrefetchScalarGridSpec(
            num_scalar_prefetch=0,
            grid=(n_blocks,),
            in_specs=in_specs,
            out_specs=pl.BlockSpec((tm_eff, E), lambda i: (i, 0)),
        ),
        compiler_params=pltpu.CompilerParams(
            dimension_semantics=("parallel",)),
    )(*operands)

    out = out_flat[:N].reshape(B, Dp, Hp, Wp, E)
    if channels_last:
        return out                                          # (B, Dp, Hp, Wp, E)
    # torch-compatible NCDHW layout (one extra HBM pass; prefer
    # channels_last=True when the consumer accepts token-major layout).
    return jnp.transpose(out, (0, 4, 1, 2, 3))              # (B, E, Dp, Hp, Wp)


def patch_embed3d_reference(x, w, b, gamma=None, beta=None, *,
                            patch_size=(2, 4, 4), use_norm=False):
    """Pure-JAX reference mirroring the PyTorch forward (n_divs == 1)."""
    pd, ph, pw = patch_size
    B, C, D, H, W = x.shape
    x = jnp.pad(x, ((0, 0), (0, 0),
                    (0, (-D) % pd), (0, (-H) % ph), (0, (-W) % pw)))
    y = lax.conv_general_dilated(
        x, w, window_strides=patch_size, padding="VALID",
        dimension_numbers=("NCDHW", "OIDHW", "NCDHW"))
    y = y + b[None, :, None, None, None]
    if use_norm:
        Bo, E, Dp, Hp, Wp = y.shape
        t = jnp.transpose(y.reshape(Bo, E, -1), (0, 2, 1))
        mu = jnp.mean(t, axis=-1, keepdims=True)
        var = jnp.mean((t - mu) ** 2, axis=-1, keepdims=True)
        t = (t - mu) / jnp.sqrt(var + EPS) * gamma + beta
        y = jnp.transpose(t, (0, 2, 1)).reshape(Bo, E, Dp, Hp, Wp)
    return y


if __name__ == "__main__":
    key = jax.random.PRNGKey(0)
    # Small shapes consistent with PatchEmbed3D defaults: in_chans=3,
    # patch_size=(2,4,4), embed_dim=96.  D/H/W chosen non-divisible to
    # exercise the padding branch.
    B, Cin, D, H, W = 2, 3, 5, 14, 14
    patch_size = (2, 4, 4)
    E = 96
    K = Cin * patch_size[0] * patch_size[1] * patch_size[2]

    k = jax.random.split(key, 5)
    x = jax.random.normal(k[0], (B, Cin, D, H, W), jnp.float32)
    w = jax.random.normal(k[1], (E, Cin, *patch_size), jnp.float32) / jnp.sqrt(K)
    b = 0.1 * jax.random.normal(k[2], (E,), jnp.float32)
    gamma = 1.0 + 0.1 * jax.random.normal(k[3], (E,), jnp.float32)
    beta = 0.1 * jax.random.normal(k[4], (E,), jnp.float32)

    ref_n = patch_embed3d_reference(x, w, b, gamma, beta,
                                    patch_size=patch_size, use_norm=True)
    ref_nn = patch_embed3d_reference(x, w, b, patch_size=patch_size,
                                     use_norm=False)

    # 1) Exactness path: f32 streams, LayerNorm, torch NCDHW layout.
    out_f32 = patch_embed3d_forward(x, w, b, gamma, beta,
                                    patch_size=patch_size, use_norm=True,
                                    compute_dtype=None)
    out_f32 = jax.block_until_ready(out_f32)
    assert out_f32.shape == ref_n.shape == (B, E, 3, 4, 4), out_f32.shape
    err1 = float(jnp.max(jnp.abs(out_f32 - ref_n)))
    assert err1 < 5e-4, f"max abs err (f32 norm path) {err1}"

    # 2) Perf-default path: bf16 streams, bf16 output, channels-last tokens.
    #    Tolerance loosened for bf16 input/output quantization.
    out_bf16 = patch_embed3d_forward(x, w, b, gamma, beta,
                                     patch_size=patch_size, use_norm=True,
                                     out_dtype=jnp.bfloat16, channels_last=True)
    out_bf16 = jax.block_until_ready(out_bf16)
    ref_cl = jnp.transpose(ref_n, (0, 2, 3, 4, 1))          # (B,Dp,Hp,Wp,E)
    assert out_bf16.shape == ref_cl.shape, out_bf16.shape
    err2 = float(jnp.max(jnp.abs(out_bf16.astype(jnp.float32) - ref_cl)))
    assert err2 < 1.5e-1, f"max abs err (bf16 norm path) {err2}"

    # 3) Default path (norm_layer=None): bf16 streams, no gamma/beta operands.
    out_nn = patch_embed3d_forward(x, w, b, patch_size=patch_size,
                                   use_norm=False)
    out_nn = jax.block_until_ready(out_nn)
    assert out_nn.shape == ref_nn.shape == (B, E, 3, 4, 4), out_nn.shape
    err3 = float(jnp.max(jnp.abs(out_nn - ref_nn)))
    assert err3 < 1e-1, f"max abs err (bf16 no-norm path) {err3}"

    print("KERNEL_OK")
</pallas_src>

<mosaic_0001>
module attributes {stable_mosaic.version = 11 : i64} {
  func.func @patch_embed_kernel(%arg0: i32, %arg1: memref<48x96xf32, #tpu.memory_space<vmem>>, %arg2: memref<96x96xf32, #tpu.memory_space<vmem>>, %arg3: memref<1x96xf32, #tpu.memory_space<vmem>>, %arg4: memref<1x96xf32, #tpu.memory_space<vmem>>, %arg5: memref<1x96xf32, #tpu.memory_space<vmem>>, %arg6: memref<48x96xf32, #tpu.memory_space<vmem>>) attributes {dimension_semantics = [#tpu.dimension_semantics<parallel>], iteration_bounds = array<i64: 2>, scalar_prefetch = 0 : i64, scratch_operands = 0 : i64, tpu.core_type = #tpu.core_type<tc>, window_params = [{transform_indices = @transform_0, window_bounds = array<i64: 48, 96>}, {pipeline_mode = #tpu.pipeline_mode<synchronous>, transform_indices = @transform_1, window_bounds = array<i64: 96, 96>}, {pipeline_mode = #tpu.pipeline_mode<synchronous>, transform_indices = @transform_2, window_bounds = array<i64: 1, 96>}, {pipeline_mode = #tpu.pipeline_mode<synchronous>, transform_indices = @transform_3, window_bounds = array<i64: 1, 96>}, {pipeline_mode = #tpu.pipeline_mode<synchronous>, transform_indices = @transform_4, window_bounds = array<i64: 1, 96>}, {transform_indices = @transform_5, window_bounds = array<i64: 48, 96>}]} {
    %c0 = arith.constant 0 : index
    %c0_0 = arith.constant 0 : index
    %0 = vector.load %arg1[%c0, %c0_0] : memref<48x96xf32, #tpu.memory_space<vmem>>, vector<48x96xf32>
    %c0_1 = arith.constant 0 : index
    %c0_2 = arith.constant 0 : index
    %1 = vector.load %arg2[%c0_1, %c0_2] : memref<96x96xf32, #tpu.memory_space<vmem>>, vector<96x96xf32>
    %cst = arith.constant dense<0.000000e+00> : vector<48x96xf32>
    %2 = tpu.matmul %0, %1, %cst {dimension_numbers = #tpu.dot_dimension_numbers<[1], [0], [0], [1], [0, 0, 1, 1], [], []>} : vector<48x96xf32>, vector<96x96xf32>, vector<48x96xf32> -> vector<48x96xf32>
    %c0_3 = arith.constant 0 : index
    %c0_4 = arith.constant 0 : index
    %3 = vector.load %arg3[%c0_3, %c0_4] : memref<1x96xf32, #tpu.memory_space<vmem>>, vector<1x96xf32>
    %4 = vector.broadcast %3 : vector<1x96xf32> to vector<48x96xf32>
    %5 = arith.addf %2, %4 : vector<48x96xf32>
    %cst_5 = arith.constant dense<0.000000e+00> : vector<48xf32>
    %6 = vector.multi_reduction <add>, %5, %cst_5 [1] : vector<48x96xf32> to vector<48xf32>
    %7 = vector.shape_cast %6 : vector<48xf32> to vector<48x1xf32>
    %cst_6 = arith.constant 0.010416667 : f32
    %8 = vector.broadcast %cst_6 : f32 to vector<48x1xf32>
    %9 = arith.mulf %7, %8 : vector<48x1xf32>
    %10 = vector.broadcast %9 : vector<48x1xf32> to vector<48x96xf32>
    %11 = arith.subf %5, %10 : vector<48x96xf32>
    %12 = arith.mulf %11, %11 : vector<48x96xf32>
    %cst_7 = arith.constant dense<0.000000e+00> : vector<48xf32>
    %13 = vector.multi_reduction <add>, %12, %cst_7 [1] : vector<48x96xf32> to vector<48xf32>
    %14 = vector.shape_cast %13 : vector<48xf32> to vector<48x1xf32>
    %cst_8 = arith.constant 0.010416667 : f32
    %15 = vector.broadcast %cst_8 : f32 to vector<48x1xf32>
    %16 = arith.mulf %14, %15 : vector<48x1xf32>
    %cst_9 = arith.constant 9.99999974E-6 : f32
    %17 = vector.broadcast %cst_9 : f32 to vector<48x1xf32>
    %18 = arith.addf %16, %17 : vector<48x1xf32>
    %19 = math.rsqrt %18 : vector<48x1xf32>
    %20 = vector.broadcast %19 : vector<48x1xf32> to vector<48x96xf32>
    %21 = arith.mulf %11, %20 : vector<48x96xf32>
    %c0_10 = arith.constant 0 : index
    %c0_11 = arith.constant 0 : index
    %22 = vector.load %arg4[%c0_10, %c0_11] : memref<1x96xf32, #tpu.memory_space<vmem>>, vector<1x96xf32>
    %23 = vector.broadcast %22 : vector<1x96xf32> to vector<48x96xf32>
    %24 = arith.mulf %21, %23 : vector<48x96xf32>
    %c0_12 = arith.constant 0 : index
    %c0_13 = arith.constant 0 : index
    %25 = vector.load %arg5[%c0_12, %c0_13] : memref<1x96xf32, #tpu.memory_space<vmem>>, vector<1x96xf32>
    %26 = vector.broadcast %25 : vector<1x96xf32> to vector<48x96xf32>
    %27 = arith.addf %24, %26 : vector<48x96xf32>
    %c0_14 = arith.constant 0 : index
    %c0_15 = arith.constant 0 : index
    %28 = vector.load %arg6[%c0_14, %c0_15] : memref<48x96xf32, #tpu.memory_space<vmem>>, vector<48x96xf32>
    tpu.vector_store %arg6[%c0_14, %c0_15], %27 {strides = array<i32>} : memref<48x96xf32, #tpu.memory_space<vmem>>, vector<48x96xf32>,
    return
  }
  func.func @transform_0(%arg0: i32) -> (i32, i32) {
    %c0_i32 = arith.constant 0 : i32
    %c0_i32_0 = arith.constant 0 : i32
    return %arg0, %c0_i32 : i32, i32
  }
  func.func @transform_1(%arg0: i32) -> (i32, i32) {
    %c0_i32 = arith.constant 0 : i32
    %c0_i32_0 = arith.constant 0 : i32
    %c0_i32_1 = arith.constant 0 : i32
    return %c0_i32, %c0_i32_0 : i32, i32
  }
  func.func @transform_2(%arg0: i32) -> (i32, i32) {
    %c0_i32 = arith.constant 0 : i32
    %c0_i32_0 = arith.constant 0 : i32
    %c0_i32_1 = arith.constant 0 : i32
    return %c0_i32, %c0_i32_0 : i32, i32
  }
  func.func @transform_3(%arg0: i32) -> (i32, i32) {
    %c0_i32 = arith.constant 0 : i32
    %c0_i32_0 = arith.constant 0 : i32
    %c0_i32_1 = arith.constant 0 : i32
    return %c0_i32, %c0_i32_0 : i32, i32
  }
  func.func @transform_4(%arg0: i32) -> (i32, i32) {
    %c0_i32 = arith.constant 0 : i32
    %c0_i32_0 = arith.constant 0 : i32
    %c0_i32_1 = arith.constant 0 : i32
    return %c0_i32, %c0_i32_0 : i32, i32
  }
  func.func @transform_5(%arg0: i32) -> (i32, i32) {
    %c0_i32 = arith.constant 0 : i32
    %c0_i32_0 = arith.constant 0 : i32
    return %arg0, %c0_i32 : i32, i32
  }
}

</mosaic_0001>

<bundles_post_ra>
// kernel: tpu_custom_call.1
= control target key start
LH: loop header
LB: loop body
LE: loop exit
PB: predicated region body
PF: predicated region fallthrough
CT: control target
= control target key end

     0   :  { %10 = vsyncpa [#allocation3], 0  ;;  %s1181_s0 = inlined_call_operand.hbm [shape: f32[96,96], index: 0, kind: input, shape index: {}]   ;;  %s1182_s1 = inlined_call_operand.hbm [shape: f32[96,96], index: 1, kind: input, shape index: {}]   ;;  %s1183_s2 = inlined_call_operand.vmem [shape: f32[1,96], index: 2, kind: input, shape index: {}]   ;;  %s1184_s3 = inlined_call_operand.vmem [shape: f32[1,96], index: 3, kind: input, shape index: {}]   ;;  %s1185_s4 = inlined_call_operand.vmem [shape: f32[1,96], index: 4, kind: input, shape index: {}]   ;;  %s1186_s5 = inlined_call_operand.hbm [shape: f32[96,96], index: 5, kind: output, shape index: {}]  }
   0x1   :  { %12 = vsyncpa [#allocation3 + $0x1], 0 }
   0x2   :  { %13 = vsyncpa [#allocation6], 0 }
   0x3   :  { %14 = vsyncpa [#allocation4], 0 }
   0x4   :  { %16 = vsyncpa [#allocation4 + $0x1], 0  ;;  %s938_s18 = smov 0   ;;  %s940_s19 = smov 0  }
   0x5   :  { %s942_s20 = smov 0   ;;  %s944_s21 = smov 0  }
   0x6 LB: > { %s959_s22 = sadd.s32 4294967295, %s899_s21   ;;  %s606_s23 = sadd.s32 4294967294, %s899_s21   ;;  %s899_s21 = sphi %s944_s21, %s1210_s21   ;;  %s895_s20 = sphi %s942_s20, %s1209_s20   ;;  %s891_s19 = sphi %s940_s19, %s1208_s19   ;;  %s887_s18 = sphi %s938_s18, %s1207_s18  }
   0x7   : > { %p42_p0 = scmp.ne.s32.totalorder %s891_s19, %s887_s18  ;;  %p1188_p1 = scmp.eq.s32.totalorder %s959_s22, 0 }
   0x8   : > { %p156_p3 = scmp.eq.s32.totalorder %s606_s23, 1  ;;  %p607_p5 = scmp.ge.s32.totalorder %s899_s21, 1 }
   0x9   : > { %p968_p4 = por %p1188_p1, %p42_p0  ;;  %p163_p7 = scmp.lt.s32.totalorder %s899_s21, 3 }
   0xa   : > { %p973_p6 = por %p156_p3, %p42_p0  ;;  %s901_s27 = smov [#allocation5]  }
   0xb   : > { %s1192_s24 = scalar_select %p968_p4, 1, 0 }
   0xc   : > { %s1193_s25 = scalar_select %p973_p6, 1, 0 }
   0xd   : > { %p978_p8 = pnand %p607_p5, %p163_p7  ;;  %s175_s28 = sshll.u32 %s901_s27, 4  ;;  %s176_s28 = int_to_ptr.vmem [resolvable:$true] %s175_s28 }
   0xe   : > { %s992_s30 = sadd.s32 1, %s899_s21   ;;  %s29_s6 = sadd.s32 1, %s895_s20 }
   0xf   : > { %s1194_s26 = scalar_select %p978_p8, 1, 0 }
  0x10   : > { %p712_p9 = pneg %p978_p8  ;;  %s26_s7 = ssub.s32 %s899_s21, %s992_s30 }
  0x11   : > { %s788_s8 = scalar_lea.vmem %s176_s28, 1536  ;;  %p796_p5 = scmp.lt.s32.totalorder %s176_s28, %s176_s28 }
  0x12   : > { %p987_p11 = pnand %p712_p9, %p1188_p1  ;;  %p789_p13 = scmp.ne.s32.totalorder %s176_s28, %s788_s8 }
  0x13   : > { %p797_p7 = scmp.lt.s32.totalorder %s788_s8, %s788_s8 }
  0x14   : > { %p779_p12 = pneg %p987_p11 }
  0x15   : > { %p798_p10 = por %p797_p7, %p796_p5 }
  0x16   : > { %p791_p0 = pnand %p789_p13, %p779_p12 }
  0x18   : > { %p792_p3 = pneg %p791_p0 }
  0x1a   : > { %p799_p2 = pnand %p798_p10, %p792_p3 }
  0x1c   : > { %802 = shalt.err (!%p799_p2)
}
  0x1d   : > { %s1187_s9 = smov 128   ;;  %s903_s10 = smov 8  }
  0x1e   : > { %715 = dma.hbm_to_vmem [thread:$0]  (!%p987_p11), %s1182_s1, 1536, %s176_s28, [#allocation6], %s1187_s9, %s1187_s9, %s903_s10  }
  0x1f   : > { %p27_p2 = scmp.eq.s32.totalorder %s26_s7, 0  ;;  %p36_p9 = scmp.ne.s32.totalorder %s895_s20, %s891_s19 }
  0x20   : > { %p37_p10 = scmp.eq.s32.totalorder %s899_s21, 0  ;;  %p725_p12 = scmp.lt.s32.totalorder %s899_s21, 2 }
  0x21   : > { %s1012_s13 = scalar_select %p27_p2, %s895_s20, %s29_s6  }
  0x22   : > { %p38_p13 = por %p37_p10, %p36_p9  ;;  %p1196_p0 = scmp.eq.s32.totalorder %s959_s22, 1 }
  0x23   : > { %s198_s15 = sand.u32 1, %s895_s20   ;;  %s625_s16 = smul.u32 768, %s899_s21 }
  0x24   : > { %p1016_p3 = por %p1196_p0, %p36_p9  ;;  %s702_s17 = smul.u32 48, %s198_s15 }
  0x25   : > { %p1022_p5 = pnand %p725_p12, %p38_p13  ;;  %s1029_s29 = scalar_lea.hbm %s1181_s0, %s625_s16 }
  0x26   : > { %s1197_s14 = scalar_select %p1016_p3, 1, 0 }
  0x27   : > { %s202_s6 = scalar_lea.vmem [#allocation2], %s702_s17  ;;  %s1033_s8 = scalar_lea.sflag [#allocation3], %s198_s15 }
  0x28   : > { %s209_s7 = sshll.u32 %s202_s6, 4  ;;  %s803_s11 = scalar_lea.hbm %s1029_s29, 768  ;;  %s1031_s7 = int_to_ptr.vmem [resolvable:$true] %s209_s7 }
  0x29   : > { %p804_p11 = scmp.ne.s32.totalorder %s1029_s29, %s803_s11  ;;  %p805_p7 = pneg %p1022_p5 }
  0x2a   : > { %s808_s16 = scalar_lea.hbm %s1181_s0, 1536  ;;  %p809_p10 = scmp.lt.s32.totalorder %s1029_s29, %s1181_s0 }
  0x2b   : > { %p806_p2 = pnand %p805_p7, %p804_p11  ;;  %p810_p12 = scmp.lt.s32.totalorder %s808_s16, %s803_s11 }
  0x2d   : > { %p807_p9 = pneg %p806_p2  ;;  %p811_p13 = por %p810_p12, %p809_p10 }
  0x2f   : > { %p812_p0 = pnand %p811_p13, %p807_p9 }
  0x31   : > { %815 = shalt.err (!%p812_p0)
}
  0x32   : > { %s816_s15 = scalar_lea.vmem %s1031_s7, 768  ;;  %s904_s17 = smov [#allocation2]  }
  0x33   : > { %p817_p1 = scmp.ne.s32.totalorder %s1031_s7, %s816_s15  ;;  %s821_s6 = sshll.u32 %s904_s17, 4  ;;  %s822_s6 = int_to_ptr.vmem [resolvable:$false] %s821_s6 }
  0x34   : > { %s823_s12 = scalar_lea.vmem %s822_s6, 1536  ;;  %p824_p2 = scmp.lt.s32.totalorder %s1031_s7, %s822_s6 }
  0x35   : > { %p819_p6 = pnand %p817_p1, %p805_p7  ;;  %p825_p3 = scmp.lt.s32.totalorder %s823_s12, %s816_s15 }
  0x37   : > { %p820_p11 = pneg %p819_p6  ;;  %p826_p4 = por %p825_p3, %p824_p2 }
  0x39   : > { %p827_p8 = pnand %p826_p4, %p820_p11 }
  0x3b   : > { %830 = shalt.err (!%p827_p8)
}
  0x3c   : > { %s1199_s9 = smov 128   ;;  %p1200_p1 = scmp.ne.s32.totalorder %s1194_s26, 0 }
  0x3d   : > { %719 = dma.hbm_to_vmem [thread:$0]  (!%p1022_p5), %s1029_s29, 768, %s1031_s7, %s1033_s8, %s1199_s9, %s1199_s9, %s903_s10  }
  0x3e   : > { %221 = sbr.rel (%p1200_p1) target bundleno = 626 (0x272), region = 40  ;;  %s1060_s11 = sand.u32 (!%p1200_p1), 1, %s891_s19  }
  0x3f   : > { %s703_s27 = smul.u32 (!%p1200_p1), 48, %s1060_s11  ;;  %s224_s16 = scalar_lea.sflag (!%p1200_p1), [#allocation3], %s1060_s11 }
  0x40   : > { %p1201_p4 = scmp.ne.s32.totalorder (!%p1200_p1), %s1192_s24, 0 }
  0x41   : > { %s1066_s23 = scalar_lea.vmem (!%p1200_p1), [#allocation2], %s703_s27 }
  0x43   : > { %874 = dma.done.wait (%p1201_p4), %s224_s16, 768  }
  0x44   : > { %876 = vsyncadd (%p1201_p4), %s224_s16, 4294966528  ;;  %p1202_p6 = scmp.eq.s32.totalorder %s959_s22, 0 }
  0x46   : > { %878 = dma.done.wait (%p1202_p6), [#allocation6], 1536   ;;  %p1203_p8 = pmov %p1202_p6 }
  0x47   : > { %v277_v0 = vld [vmem:[#allocation5 + $0x58] sm:$0xff]  ;;  %v276_v1 = vld [vmem:[#allocation5 + $0x50] sm:$0xff]  ;;  %v275_v2 = vld [vmem:[#allocation5 + $0x48] sm:$0xff]  ;;  %vm285_vm0 = vcmask 785408   ;;  %s257_s28 = scalar_lea.vmem [#allocation7], %s703_s27  ;;  %s626_s15 = smul.u32 768, %s959_s22 }
  0x48   : > { %880 = vsyncadd (%p1203_p8), [#allocation6], 4294965760  ;;  %645 = vmatprep.subr.mxu0 %v277_v0  ;;  %678 = vmatprep.subr.mxu1 %v277_v0  ;;  %v274_v3 = vld [vmem:[#allocation5 + $0x40] sm:$0xff]  ;;  %v273_v4 = vld [vmem:[#allocation5 + $0x38] sm:$0xff]  ;;  %s523_s17 = sshll.u32 %s257_s28, 4  ;;  %s510_s22 = scalar_lea.sflag [#allocation4], %s1060_s11  ;;  %s1137_s17 = int_to_ptr.vmem [resolvable:$true] %s523_s17 }
  0x49   : > { %646 = vmatpush3.msra.mxu0 %v277_v0  ;;  %690 = vmatpush3.msra.mxu1 %v277_v0  ;;  %v272_v5 = vld [vmem:[#allocation5 + $0x30] sm:$0xff]  ;;  %v271_v6 = vld [vmem:[#allocation5 + $0x28] sm:$0xff]  ;;  %v270_v7 = vld [vmem:[#allocation5 + $0x20] sm:$0xff]  ;;  %s1135_s9 = scalar_lea.hbm %s1186_s5, %s626_s15  ;;  %s831_s27 = scalar_lea.vmem %s1137_s17, 768 }
  0x4a   : > { %647 = vmatprep.subr.mxu0 %v276_v1  ;;  %679 = vmatprep.subr.mxu1 %v276_v1  ;;  %v269_v8 = vld [vmem:[#allocation5 + $0x18] sm:$0xff]  ;;  %v268_v9 = vld [vmem:[#allocation5 + $0x10] sm:$0xff]  ;;  %v267_v10 = vld [vmem:[#allocation5 + $0x8] sm:$0xff]  ;;  %p832_p3 = scmp.ne.s32.totalorder %s1137_s17, %s831_s27  ;;  %p1204_p5 = scmp.ne.s32.totalorder %s1197_s14, 0 }
  0x4b   : > { %648 = vmatpush3.msra.mxu0 %v276_v1  ;;  %691 = vmatpush3.msra.mxu1 %v276_v1  ;;  %v266_v11 = vld [vmem:[#allocation5] sm:$0xff]  ;;  %v261_v14 = vld [vmem:[%s1066_s23 + $0x8] sm:$0xff]  ;;  %v263_v15 = vld [vmem:[%s1066_s23 + $0x18] sm:$0xff]  ;;  %s905_s16 = smov [#allocation7]  }
  0x4c   : > { %649 = vmatprep.subr.mxu0 %v275_v2  ;;  %680 = vmatprep.subr.mxu1 %v275_v2  ;;  %v260_v12 = vld [vmem:[%s1066_s23] sm:$0xff]  ;;  %v262_v13 = vld [vmem:[%s1066_s23 + $0x10] sm:$0xff]  ;;  %v265_v17 = vld [vmem:[%s1066_s23 + $0x28] sm:$0xff]  ;;  %p833_p7 = pnand %p832_p3, %p1204_p5 }
  0x4d   : > { %650 = vmatpush3.msra.mxu0 %v275_v2  ;;  %692 = vmatpush3.msra.mxu1 %v275_v2  ;;  %v264_v16 = vld [vmem:[%s1066_s23 + $0x20] sm:$0xff]  ;;  %s835_s23 = sshll.u32 %s905_s16, 4  ;;  %s836_s23 = int_to_ptr.vmem [resolvable:$false] %s835_s23 }
  0x4e   : > { %651 = vmatprep.subr.mxu0 %v274_v3  ;;  %681 = vmatprep.subr.mxu1 %v274_v3  ;;  %v613_v18 = vld [vmem:[%s1183_s2] ss:$0 sm:$0xff]  ;;  %p834_p9 = pneg %p833_p7  ;;  %s837_s24 = scalar_lea.vmem %s836_s23, 1536 }
  0x4f   : > { %652 = vmatpush3.msra.mxu0 %v274_v3  ;;  %693 = vmatpush3.msra.mxu1 %v274_v3  ;;  %p838_p10 = scmp.lt.s32.totalorder %s1137_s17, %s836_s23  ;;  %p839_p12 = scmp.lt.s32.totalorder %s837_s24, %s831_s27 }
  0x50   : > { %653 = vmatprep.subr.mxu0 %v273_v4  ;;  %682 = vmatprep.subr.mxu1 %v273_v4 }
  0x51   : > { %654 = vmatpush3.msra.mxu0 %v273_v4  ;;  %694 = vmatpush3.msra.mxu1 %v273_v4  ;;  %p840_p13 = por %p839_p12, %p838_p10 }
  0x52   : > { %655 = vmatprep.subr.mxu0 %v272_v5  ;;  %683 = vmatprep.subr.mxu1 %v272_v5 }
  0x53   : > { %656 = vmatpush3.msra.mxu0 %v272_v5  ;;  %695 = vmatpush3.msra.mxu1 %v272_v5  ;;  %p841_p0 = pnand %p840_p13, %p834_p9 }
  0x54   : > { %657 = vmatprep.subr.mxu0 %v271_v6  ;;  %684 = vmatprep.subr.mxu1 %v271_v6 }
  0x55   : > { %658 = vmatpush3.msra.mxu0 %v271_v6  ;;  %696 = vmatpush3.msra.mxu1 %v271_v6 }
  0x56   : > { %659 = vmatprep.subr.mxu0 %v270_v7  ;;  %685 = vmatprep.subr.mxu1 %v270_v7 }
  0x57   : > { %660 = vmatpush3.msra.mxu0 %v270_v7  ;;  %697 = vmatpush3.msra.mxu1 %v270_v7 }
  0x58   : > { %661 = vmatprep.subr.mxu0 %v269_v8  ;;  %686 = vmatprep.subr.mxu1 %v269_v8 }
  0x59   : > { %662 = vmatpush3.msra.mxu0 %v269_v8  ;;  %698 = vmatpush3.msra.mxu1 %v269_v8 }
  0x5a   : > { %663 = vmatprep.subr.mxu0 %v268_v9  ;;  %687 = vmatprep.subr.mxu1 %v268_v9 }
  0x5b   : > { %664 = vmatpush3.msra.mxu0 %v268_v9  ;;  %699 = vmatpush3.msra.mxu1 %v268_v9 }
  0x5c   : > { %665 = vmatprep.subr.mxu0 %v267_v10  ;;  %688 = vmatprep.subr.mxu1 %v267_v10 }
  0x5d   : > { %666 = vmatpush3.msra.mxu0 %v267_v10  ;;  %700 = vmatpush3.msra.mxu1 %v267_v10 }
  0x5e   : > { %667 = vmatprep.subr.mxu0 %v266_v11  ;;  %689 = vmatprep.subr.mxu1 %v266_v11 }
  0x5f   : > { %668 = vmatpush3.msra.mxu0 %v266_v11  ;;  %701 = vmatpush3.msra.mxu1 %v266_v11 }
  0x60   : > { %669 = vmatprep.mubr.msk.f32.mxu0 %vm285_vm0, %v260_v12  ;;  %672 = vmatprep.mubr.msk.f32.mxu1 %vm285_vm0, %v262_v13 }
  0x61   : > { %670 = vmatmul.mubr.msk.f32.vlgmr.msra.gmra.mxu0 %vm285_vm0, %v261_v14  ;;  %673 = vmatmul.mubr.msk.f32.vlgmr.msra.gmra.mxu1 %vm285_vm0, %v263_v15 }
  0x62   : > { %675 = vmatprep.mubr.msk.f32.mxu1 %vm285_vm0, %v264_v16 }
  0x65   : > { %676 = vmatmul.mubr.msk.f32.gmra.mxu1 %vm285_vm0, %v265_v17 }
 0x121   : > { %v671_v19 = vpop.f32.mrf.mxu0  ;;  %v674_v20 = vpop.f32.mrf.mxu1 }
 0x122   : > { %v376_v21 = vadd.f32 %v671_v19, %v613_v18  ;;  %v386_v22 = vadd.f32 %v674_v20, %v613_v18 }
 0x123   : > { %v370_v23 = vpop.f32.mrf.mxu0  ;;  %v380_v24 = vpop.f32.mrf.mxu1 }
 0x124   : > { %v371_v25 = vadd.f32 %v613_v18, %v370_v23  ;;  %v408_v26 = vsel %vm285_vm0, %v386_v22, 0.0  ;;  %v381_v27 = vadd.f32 %v613_v18, %v380_v24  ;;  %v402_v28 = vsel %vm285_vm0, %v376_v21, 0.0  ;;  %v621_v24 = vld [vmem:[%s1185_s4] ss:$0 sm:$0xff] }
 0x125   : > { %409 = vadd.xlane.f32.xlu1 %v408_v26  ;;  %403 = vadd.xlane.f32.xlu0 %v402_v28  ;;  %v677_v29 = vpop.f32.mrf.mxu1 }
 0x126   : > { %v396_v30 = vadd.f32 %v677_v29, %v613_v18  ;;  %v405_v31 = vsel %vm285_vm0, %v381_v27, 0.0  ;;  %v399_v34 = vsel %vm285_vm0, %v371_v25, 0.0 }
 0x127   : > { %v390_v32 = vpop.f32.mrf.mxu1 }
 0x128   : > { %v391_v33 = vadd.f32 %v613_v18, %v390_v32  ;;  %v414_v35 = vsel %vm285_vm0, %v396_v30, 0.0 }
 0x129   : > { %406 = vadd.xlane.f32.xlu1 %v405_v31  ;;  %400 = vadd.xlane.f32.xlu0 %v399_v34 }
 0x12a   : > { %v411_v36 = vsel %vm285_vm0, %v391_v33, 0.0 }
 0x12d   : > { %415 = vadd.xlane.f32.xlu1 %v414_v35  ;;  %412 = vadd.xlane.f32.xlu0 %v411_v36 }
 0x1ae   : > { %v410_v37 = vpop.xlane.xlu1 %409  ;;  %v404_v38 = vpop.xlane.xlu0 %403 }
 0x1af   : > { %v420_v39 = vmul.f32 0.010416667, %v410_v37  ;;  %v418_v40 = vmul.f32 0.010416667, %v404_v38 }
 0x1b1   : > { %v1097_v41 = vsub.f32 %v386_v22, %v420_v39  ;;  %v424_v42 = vsub.f32 %v376_v21, %v418_v40  ;;  %v620_v22 = vld [vmem:[%s1184_s3] ss:$0 sm:$0xff] }
 0x1b2   : > { %v407_v43 = vpop.xlane.xlu1 %406  ;;  %v401_v44 = vpop.xlane.xlu0 %400 }
 0x1b3   : > { %v419_v45 = vmul.f32 0.010416667, %v407_v43  ;;  %v417_v46 = vmul.f32 0.010416667, %v401_v44  ;;  %v430_v47 = vmul.f32 %v424_v42, %v424_v42  ;;  %v432_v48 = vmul.f32 %v1097_v41, %v1097_v41 }
 0x1b5   : > { %v1101_v49 = vsub.f32 %v381_v27, %v419_v45  ;;  %v423_v50 = vsub.f32 %v371_v25, %v417_v46  ;;  %v438_v51 = vsel %vm285_vm0, %v430_v47, 0.0  ;;  %v444_v57 = vsel %vm285_vm0, %v432_v48, 0.0 }
 0x1b6   : > { %v416_v52 = vpop.xlane.xlu1 %415  ;;  %439 = vadd.xlane.f32.xlu1 %v438_v51  ;;  %v413_v53 = vpop.xlane.xlu0 %412 }
 0x1b7   : > { %v422_v54 = vmul.f32 0.010416667, %v416_v52  ;;  %v421_v55 = vmul.f32 0.010416667, %v413_v53  ;;  %v429_v56 = vmul.f32 %v423_v50, %v423_v50  ;;  %v431_v61 = vmul.f32 %v1101_v49, %v1101_v49 }
 0x1b9   : > { %v428_v58 = vsub.f32 %v396_v30, %v422_v54  ;;  %v1105_v59 = vsub.f32 %v391_v33, %v421_v55  ;;  %v435_v60 = vsel %vm285_vm0, %v429_v56, 0.0  ;;  %v441_v0 = vsel %vm285_vm0, %v431_v61, 0.0 }
 0x1ba   : > { %445 = vadd.xlane.f32.xlu1 %v444_v57  ;;  %436 = vadd.xlane.f32.xlu0 %v435_v60 }
 0x1bb   : > { %v434_v62 = vmul.f32 %v428_v58, %v428_v58  ;;  %v433_v1 = vmul.f32 %v1105_v59, %v1105_v59 }
 0x1bd   : > { %v450_v63 = vsel %vm285_vm0, %v434_v62, 0.0  ;;  %v447_v2 = vsel %vm285_vm0, %v433_v1, 0.0 }
 0x1be   : > { %451 = vadd.xlane.f32.xlu1 %v450_v63  ;;  %442 = vadd.xlane.f32.xlu0 %v441_v0 }
 0x1c2   : > { %448 = vadd.xlane.f32.xlu0 %v447_v2 }
 0x23f   : > { %v440_v3 = vpop.xlane.xlu1 %439 }
 0x240   : > { %v454_v4 = vmul.f32 0.010416667, %v440_v3 }
 0x242   : > { %v460_v5 = vadd.f32 1e-05, %v454_v4 }
 0x243   : > { %v446_v6 = vpop.xlane.xlu1 %445  ;;  %v437_v7 = vpop.xlane.xlu0 %436 }
 0x244   : > { %765 = vrsqrt.f32 %v460_v5  ;;  %v456_v8 = vmul.f32 0.010416667, %v446_v6  ;;  %v453_v9 = vmul.f32 0.010416667, %v437_v7 }
 0x246   : > { %v462_v10 = vadd.f32 1e-05, %v456_v8  ;;  %v459_v11 = vadd.f32 1e-05, %v453_v9 }
 0x247   : > { %v452_v12 = vpop.xlane.xlu1 %451  ;;  %v443_v13 = vpop.xlane.xlu0 %442 }
 0x248   : > { %767 = vrsqrt.f32 %v462_v10  ;;  %v458_v14 = vmul.f32 0.010416667, %v452_v12  ;;  %v455_v15 = vmul.f32 0.010416667, %v443_v13 }
 0x249   : > { %769 = vrsqrt.f32 %v459_v11 }
 0x24a   : > { %v464_v16 = vadd.f32 1e-05, %v458_v14  ;;  %v461_v17 = vadd.f32 1e-05, %v455_v15 }
 0x24b   : > { %v449_v18 = vpop.xlane.xlu0 %448 }
 0x24c   : > { %771 = vrsqrt.f32 %v464_v16  ;;  %v457_v19 = vmul.f32 0.010416667, %v449_v18 }
 0x24d   : > { %773 = vrsqrt.f32 %v461_v17 }
 0x24e   : > { %v463_v20 = vadd.f32 1e-05, %v457_v19 }
 0x250   : > { %775 = vrsqrt.f32 %v463_v20 }
 0x251   : > { %v766_v21 = vpop.eup %765 }
 0x252   : > { %v472_v23 = vmul.f32 %v766_v21, %v424_v42 }
 0x254   : > { %v485_v25 = vmul.f32 %v620_v22, %v472_v23 }
 0x255   : > { %v768_v26 = vpop.eup %767 }
 0x256   : > { %v770_v27 = vpop.eup %769  ;;  %v498_v28 = vadd.f32 %v621_v24, %v485_v25  ;;  %v474_v29 = vmul.f32 %v768_v26, %v1097_v41 }
 0x257   : > { %v471_v30 = vmul.f32 %v770_v27, %v423_v50 }
 0x258   : > { %504 = vst.msk [vmem:[%s257_s28 + $0x8] sm:$0xff] %vm285_vm0, %v498_v28  ;;  %v487_v31 = vmul.f32 %v620_v22, %v474_v29 }
 0x259   : > { %v772_v32 = vpop.eup %771  ;;  %v484_v33 = vmul.f32 %v620_v22, %v471_v30 }
 0x25a   : > { %v774_v34 = vpop.eup %773  ;;  %v500_v35 = vadd.f32 %v621_v24, %v487_v31  ;;  %v476_v36 = vmul.f32 %v772_v32, %v428_v58 }
 0x25b   : > { %v497_v37 = vadd.f32 %v621_v24, %v484_v33  ;;  %v473_v38 = vmul.f32 %v774_v34, %v1101_v49 }
 0x25c   : > { %506 = vst.msk [vmem:[%s257_s28 + $0x18] sm:$0xff] %vm285_vm0, %v500_v35  ;;  %v489_v39 = vmul.f32 %v620_v22, %v476_v36 }
 0x25d   : > { %v776_v40 = vpop.eup %775  ;;  %503 = vst.msk [vmem:[%s257_s28] sm:$0xff] %vm285_vm0, %v497_v37  ;;  %v486_v41 = vmul.f32 %v620_v22, %v473_v38 }
 0x25e   : > { %v502_v42 = vadd.f32 %v621_v24, %v489_v39  ;;  %v475_v43 = vmul.f32 %v776_v40, %v1105_v59 }
 0x25f   : > { %v499_v44 = vadd.f32 %v621_v24, %v486_v41 }
 0x260   : > { %508 = vst.msk [vmem:[%s257_s28 + $0x28] sm:$0xff] %vm285_vm0, %v502_v42  ;;  %v488_v45 = vmul.f32 %v620_v22, %v475_v43 }
 0x261   : > { %505 = vst.msk [vmem:[%s257_s28 + $0x10] sm:$0xff] %vm285_vm0, %v499_v44 }
 0x262   : > { %v501_v46 = vadd.f32 %v621_v24, %v488_v45 }
 0x264   : > { %507 = vst.msk [vmem:[%s257_s28 + $0x20] sm:$0xff] %vm285_vm0, %v501_v46 }
 0x265   : > { %844 = shalt.err (!%p841_p0)
}
 0x266   : > { %s845_s26 = scalar_lea.hbm %s1135_s9, 768  ;;  %s849_s7 = scalar_lea.hbm %s1186_s5, 1536 }
 0x267   : > { %p846_p11 = scmp.ne.s32.totalorder %s1135_s9, %s845_s26  ;;  %p850_p4 = scmp.lt.s32.totalorder %s1135_s9, %s1186_s5 }
 0x268   : > { %p851_p6 = scmp.lt.s32.totalorder %s849_s7, %s845_s26 }
 0x269   : > { %p847_p2 = pnand %p846_p11, %p1204_p5 }
 0x26a   : > { %p852_p8 = por %p851_p6, %p850_p4 }
 0x26b   : > { %p848_p1 = pneg %p847_p2 }
 0x26d   : > { %p853_p3 = pnand %p852_p8, %p848_p1 }
 0x26f   : > { %856 = shalt.err (!%p853_p3)
}
 0x270   : > { %s906_s15 = smov 128   ;;  %s907_s6 = smov 8  }
 0x271   : > { %710 = dma.vmem_to_hbm [thread:$0]  (%p1204_p5), %s1137_s17, 768, %s1135_s9, %s510_s22, %s906_s15, %s906_s15, %s907_s6  }
 0x272 PF: > { %s538_s12 = sand.u32 1, %s887_s18   ;;  %p1205_p7 = scmp.ne.s32.totalorder %s1193_s25, 0 }
 0x273   : > { %p1206_p9 = scmp.ge.s32.totalorder %s899_s21, 2  ;;  %s539_s27 = scalar_lea.sflag [#allocation4], %s538_s12 }
 0x275   : > { %p721_p10 = pnand %p1206_p9, %p1205_p7 }
 0x277   : > { %p722_p12 = pneg %p721_p10 }
 0x279   : > { %882 = dma.done.wait (%p722_p12), %s539_s27, 768  }
 0x27a   : > { %884 = vsyncadd (%p722_p12), %s539_s27, 4294966528  ;;  %p19_p13 = scmp.ge.s32.totalorder %s992_s30, 4   ;;  %s1207_s18 = smov %s891_s19 }
 0x27b   : > { %s1208_s19 = smov %s895_s20  ;;  %s1209_s20 = smov %s1012_s13 }
 0x27c   : > { %s1210_s21 = smov %s992_s30  ;;  %21 = sbr.rel (!%p19_p13) target bundleno = 6 (0x6), region = 89 }
 0x281   :  { %544 = vsyncpa [#allocation3], 1 }
 0x282   :  { %546 = vsyncpa [#allocation3 + $0x1], 1 }
 0x283   :  { %547 = vsyncpa [#allocation6], 1 }
 0x284   :  { %548 = vsyncpa [#allocation4], 1 }
 0x285   :  { %550 = vsyncpa [#allocation4 + $0x1], 1 }

</bundles_post_ra>
